<compile_context>
chip_gen: v5e
topology: v5e:2x2
jax: 0.10.0
libtpu: 0.0.40
codegen_flags: <defaults>
</compile_context>

<pallas_src>
import jax
import jax.numpy as jnp
import numpy as np
from jax.experimental import pallas as pl
from jax.experimental.pallas import tpu as pltpu


def ncf_kernel(idx_ref, p_ref, out_ref):
    # idx_ref: (2, TB) int32 — row 0 = user index, row 1 = item index + NU
    #                          (items pre-shifted into the combined table).
    # p_ref  : (1, NP)  f32  — combined logit table [W@w_u + b | H@w_v | 0-pad],
    #                          grid-invariant (fetched once, not re-DMAed).
    # out_ref: (1, TB)  f32  — sigmoid(logits), lane-dense store.
    idx = idx_ref[...]                                   # (2, TB)
    tb = idx.shape[1]
    np_tot = p_ref.shape[1]

    # Two-hot gather matrix: twohot[n, j] = (n == uidx[j]) OR (n == NU + iidx[j]).
    # Index ranges are disjoint, so a single matmul yields
    #   logits[j] = p_u[uidx[j]] + p_i[iidx[j]]   (bias already folded into p_u).
    row = jax.lax.broadcasted_iota(jnp.int32, (np_tot, tb), 0)
    twohot = ((row == idx[0:1, :]) | (row == idx[1:2, :])).astype(jnp.float32)

    logits = jnp.dot(p_ref[...], twohot, preferred_element_type=jnp.float32)  # (1, TB)
    out_ref[...] = jax.nn.sigmoid(logits)


def ncf_forward(x, W, H, w_lin, b_lin, *, tb=256):
    """x: (B, 2) int [user_idx, item_idx]; returns sigmoid(Linear(cat(W[u], H[i]))) of shape (B,)."""
    B = x.shape[0]
    nu, k = W.shape
    ni, _ = H.shape

    # One-time algebraic precompute: collapses the K dimension out of the kernel.
    w_u = w_lin[0, :k].astype(jnp.float32)               # (K,)
    w_v = w_lin[0, k:].astype(jnp.float32)               # (K,)
    p_u = W.astype(jnp.float32) @ w_u + b_lin[0]         # (NU,)  bias folded in
    p_i = H.astype(jnp.float32) @ w_v                    # (NI,)
    np_tot = ((nu + ni + 127) // 128) * 128              # lane-pad combined table
    p = jnp.zeros((1, np_tot), jnp.float32)
    p = p.at[0, :nu].set(p_u).at[0, nu:nu + ni].set(p_i)

    # Pad batch to a multiple of the lane tile. Padded lanes read index 0 (a valid
    # table row -> finite logits), and are sliced off at the end.
    b_pad = ((B + tb - 1) // tb) * tb
    idx = jnp.zeros((2, b_pad), jnp.int32)
    idx = idx.at[0, :B].set(x[:, 0].astype(jnp.int32))
    idx = idx.at[1, :B].set(x[:, 1].astype(jnp.int32) + nu)   # pre-shift item indices
    num_tiles = b_pad // tb

    out = pl.pallas_call(
        ncf_kernel,
        out_shape=jax.ShapeDtypeStruct((1, b_pad), jnp.float32),
        grid_spec=pltpu.PrefetchScalarGridSpec(
            num_scalar_prefetch=0,
            grid=(num_tiles,),
            in_specs=[
                pl.BlockSpec((2, tb), lambda i: (0, i)),         # fused [user; item+NU] indices
                pl.BlockSpec((1, np_tot), lambda i: (0, 0)),     # combined logit table (invariant)
            ],
            out_specs=pl.BlockSpec((1, tb), lambda i: (0, i)),   # lane-dense output row
        ),
        compiler_params=pltpu.CompilerParams(dimension_semantics=("parallel",)),
        # TODO(synk): for production-sized user/item tables (NU+NI >> VMEM-friendly),
        # replace the two-hot matmul with a manual-DMA gather over an HBM-resident table.
    )(idx, p)

    return out.reshape(b_pad)[:B]              # squeeze + drop padding -> (B,)


if __name__ == "__main__":
    num_users, num_items, embedding_k = 32, 48, 64
    B = 512                                    # 2 grid steps at tb=256 (feeds both v7x TCs)

    key = jax.random.PRNGKey(0)
    k_w, k_h, k_lin, k_b, k_u, k_i = jax.random.split(key, 6)

    # Deterministic synthetic parameters (shapes from NCF.__init__).
    W = jax.random.normal(k_w, (num_users, embedding_k), dtype=jnp.float32)
    H = jax.random.normal(k_h, (num_items, embedding_k), dtype=jnp.float32)
    bound = 1.0 / np.sqrt(2 * embedding_k)
    w_lin = jax.random.uniform(k_lin, (1, 2 * embedding_k), minval=-bound, maxval=bound,
                               dtype=jnp.float32)
    b_lin = jax.random.uniform(k_b, (1,), minval=-bound, maxval=bound, dtype=jnp.float32)

    # Input x: (B, 2) int indices [user, item].
    users = jax.random.randint(k_u, (B, 1), 0, num_users, dtype=jnp.int32)
    items = jax.random.randint(k_i, (B, 1), 0, num_items, dtype=jnp.int32)
    x = jnp.concatenate([users, items], axis=1)

    out = jax.block_until_ready(ncf_forward(x, W, H, w_lin, b_lin))

    # Pure-JAX reference (matches the PyTorch forward exactly).
    u_emb = W[x[:, 0]]
    v_emb = H[x[:, 1]]
    z = jnp.concatenate([u_emb, v_emb], axis=1)
    ref = jax.nn.sigmoid(z @ w_lin.T + b_lin)[:, 0]
    assert out.shape == (B,)
    assert np.allclose(np.asarray(out), np.asarray(ref), atol=1e-5, rtol=1e-5)

    print("KERNEL_OK")
</pallas_src>

<mosaic_0001>
module attributes {stable_mosaic.version = 11 : i64} {
  func.func @ncf_kernel(%arg0: i32, %arg1: memref<2x256xi32, #tpu.memory_space<vmem>>, %arg2: memref<1x128xf32, #tpu.memory_space<vmem>>, %arg3: memref<1x256xf32, #tpu.memory_space<vmem>>) attributes {dimension_semantics = [#tpu.dimension_semantics<parallel>], iteration_bounds = array<i64: 2>, scalar_prefetch = 0 : i64, scratch_operands = 0 : i64, tpu.core_type = #tpu.core_type<tc>, window_params = [{transform_indices = @transform_0, window_bounds = array<i64: 2, 256>}, {pipeline_mode = #tpu.pipeline_mode<synchronous>, transform_indices = @transform_1, window_bounds = array<i64: 1, 128>}, {transform_indices = @transform_2, window_bounds = array<i64: 1, 256>}]} {
    %c0 = arith.constant 0 : index
    %c0_0 = arith.constant 0 : index
    %0 = vector.load %arg1[%c0, %c0_0] : memref<2x256xi32, #tpu.memory_space<vmem>>, vector<2x256xi32>
    %1 = tpu.iota {dimensions = array<i32: 0>} : vector<128x256xi32>
    %2 = vector.extract_strided_slice %0 {offsets = [0, 0], sizes = [1, 256], strides = [1, 1]} : vector<2x256xi32> to vector<1x256xi32>
    %3 = vector.broadcast %2 : vector<1x256xi32> to vector<128x256xi32>
    %4 = arith.cmpi eq, %1, %3 : vector<128x256xi32>
    %5 = vector.extract_strided_slice %0 {offsets = [1, 0], sizes = [1, 256], strides = [1, 1]} : vector<2x256xi32> to vector<1x256xi32>
    %6 = vector.broadcast %5 : vector<1x256xi32> to vector<128x256xi32>
    %7 = arith.cmpi eq, %1, %6 : vector<128x256xi32>
    %8 = arith.ori %4, %7 : vector<128x256xi1>
    %9 = arith.extui %8 : vector<128x256xi1> to vector<128x256xi32>
    %10 = arith.sitofp %9 : vector<128x256xi32> to vector<128x256xf32>
    %c0_1 = arith.constant 0 : index
    %c0_2 = arith.constant 0 : index
    %11 = vector.load %arg2[%c0_1, %c0_2] : memref<1x128xf32, #tpu.memory_space<vmem>>, vector<1x128xf32>
    %cst = arith.constant dense<0.000000e+00> : vector<1x256xf32>
    %12 = tpu.matmul %11, %10, %cst {dimension_numbers = #tpu.dot_dimension_numbers<[1], [0], [0], [1], [0, 0, 1, 1], [], []>} : vector<1x128xf32>, vector<128x256xf32>, vector<1x256xf32> -> vector<1x256xf32>
    %13 = arith.negf %12 : vector<1x256xf32>
    %14 = math.exp %13 : vector<1x256xf32>
    %cst_3 = arith.constant 1.000000e+00 : f32
    %15 = vector.broadcast %cst_3 : f32 to vector<1x256xf32>
    %16 = arith.addf %15, %14 : vector<1x256xf32>
    %17 = arith.divf %15, %16 : vector<1x256xf32>
    %c0_4 = arith.constant 0 : index
    %c0_5 = arith.constant 0 : index
    %18 = vector.load %arg3[%c0_4, %c0_5] : memref<1x256xf32, #tpu.memory_space<vmem>>, vector<1x256xf32>
    tpu.vector_store %arg3[%c0_4, %c0_5], %17 {strides = array<i32>} : memref<1x256xf32, #tpu.memory_space<vmem>>, vector<1x256xf32>,
    return
  }
  func.func @transform_0(%arg0: i32) -> (i32, i32) {
    %c0_i32 = arith.constant 0 : i32
    %c0_i32_0 = arith.constant 0 : i32
    return %c0_i32, %arg0 : i32, i32
  }
  func.func @transform_1(%arg0: i32) -> (i32, i32) {
    %c0_i32 = arith.constant 0 : i32
    %c0_i32_0 = arith.constant 0 : i32
    %c0_i32_1 = arith.constant 0 : i32
    return %c0_i32, %c0_i32_0 : i32, i32
  }
  func.func @transform_2(%arg0: i32) -> (i32, i32) {
    %c0_i32 = arith.constant 0 : i32
    %c0_i32_0 = arith.constant 0 : i32
    return %c0_i32, %arg0 : i32, i32
  }
}

</mosaic_0001>

<bundles_post_ra>
// kernel: tpu_custom_call.1
= control target key start
LH: loop header
LB: loop body
LE: loop exit
PB: predicated region body
PF: predicated region fallthrough
CT: control target
= control target key end

     0   :  { %7 = vsyncpa [#allocation3], 0  ;;  %s1120_s0 = inlined_call_operand.hbm [shape: s32[2,512], index: 0, kind: input, shape index: {}]   ;;  %s1121_s1 = inlined_call_operand.hbm [shape: f32[1,128], index: 1, kind: input, shape index: {}]   ;;  %s1122_s2 = inlined_call_operand.hbm [shape: f32[1,512], index: 2, kind: output, shape index: {}]  }
   0x1   :  { %9 = vsyncpa [#allocation3 + $0x1], 0 }
   0x2   :  { %10 = vsyncpa [#allocation6], 0 }
   0x3   :  { %11 = vsyncpa [#allocation4], 0 }
   0x4   :  { %13 = vsyncpa [#allocation4 + $0x1], 0  ;;  %s848_s9 = smov 0   ;;  %s850_s10 = smov 0  }
   0x5   :  { %s852_s11 = smov 0   ;;  %s854_s12 = smov 0  }
   0x6 LB: > { %s869_s13 = sadd.s32 4294967295, %s829_s12   ;;  %s551_s14 = sadd.s32 4294967294, %s829_s12   ;;  %s829_s12 = sphi %s854_s12, %s1134_s12   ;;  %s825_s11 = sphi %s852_s11, %s1133_s11   ;;  %s821_s10 = sphi %s850_s10, %s1132_s10   ;;  %s817_s9 = sphi %s848_s9, %s1131_s9  }
   0x7   : > { %p39_p0 = scmp.ne.s32.totalorder %s821_s10, %s817_s9  ;;  %p40_p1 = scmp.eq.s32.totalorder %s869_s13, 0 }
   0x8   : > { %p84_p2 = scmp.eq.s32.totalorder %s869_s13, 1  ;;  %p90_p3 = scmp.eq.s32.totalorder %s551_s14, 1 }
   0x9   : > { %p878_p4 = por %p40_p1, %p39_p0  ;;  %p552_p5 = scmp.ge.s32.totalorder %s829_s12, 1 }
   0xa   : > { %p883_p6 = por %p90_p3, %p39_p0  ;;  %p97_p7 = scmp.lt.s32.totalorder %s829_s12, 3 }
   0xb   : > { %s109_s19 = sshll.u32 %s1121_s1, 4  ;;  %s831_s21 = smov [#allocation5]   ;;  %s110_s19 = int_to_ptr.hbm [resolvable:$true] %s109_s19 }
   0xc   : > { %p891_p8 = pnand %p552_p5, %p97_p7  ;;  %s111_s22 = sshll.u32 %s831_s21, 4  ;;  %s112_s22 = int_to_ptr.vmem [resolvable:$true] %s111_s22 }
   0xd   : > { %s901_s23 = sadd.s32 1, %s829_s12   ;;  %s26_s24 = sadd.s32 1, %s825_s11 }
   0xe   : > { %p641_p10 = pneg %p891_p8  ;;  %s23_s25 = ssub.s32 %s829_s12, %s901_s23 }
   0xf   : > { %p24_p12 = scmp.eq.s32.totalorder %s23_s25, 0  ;;  %p33_p13 = scmp.ne.s32.totalorder %s825_s11, %s821_s10 }
  0x10   : > { %p642_p11 = pnand %p641_p10, %p40_p1  ;;  %p34_p0 = scmp.eq.s32.totalorder %s829_s12, 0 }
  0x11   : > { %s910_s26 = scalar_select %p24_p12, %s825_s11, %s26_s24  }
  0x12   : > { %644 = dma.hbm_to_vmem [thread:$0]  (!%p642_p11), %s110_s19, 16, %s112_s22, [#allocation6]  }
  0x13   : > { %p914_p3 = por %p84_p2, %p33_p13  ;;  %p654_p5 = scmp.lt.s32.totalorder %s829_s12, 2 }
  0x14   : > { %s122_s28 = sand.u32 1, %s825_s11   ;;  %s632_s29 = sshll.u32 %s829_s12, 2 }
  0x15   : > { %p35_p7 = por %p34_p0, %p33_p13  ;;  %s555_s30 = sshll.u32 %s122_s28, 2 }
  0x16   : > { %s131_s5 = scalar_lea.hbm %s1120_s0, %s632_s29  ;;  %s126_s7 = scalar_lea.vmem [#allocation2], %s555_s30 }
  0x17   : > { %s133_s6 = sshll.u32 %s131_s5, 4  ;;  %s135_s8 = sshll.u32 %s126_s7, 4  ;;  %s134_s6 = int_to_ptr.hbm [resolvable:$true] %s133_s6  ;;  %s136_s8 = int_to_ptr.vmem [resolvable:$true] %s135_s8 }
  0x18   : > { %p924_p10 = pnand %p654_p5, %p35_p7  ;;  %s123_s17 = scalar_lea.sflag [#allocation3], %s122_s28 }
  0x19   : > { %s729_s18 = sshra.s32 %s134_s6, 4  ;;  %s736_s24 = scalar_lea.hbm %s1120_s0, 8  ;;  %s730_s18 = int_to_ptr.hbm [resolvable:$true] %s729_s18 }
  0x1a   : > { %s731_s19 = scalar_lea.hbm %s730_s18, 4  ;;  %p733_p11 = pneg %p924_p10 }
  0x1b   : > { %p732_p2 = scmp.ne.s32.totalorder %s730_s18, %s731_s19  ;;  %p737_p0 = scmp.lt.s32.totalorder %s730_s18, %s1120_s0 }
  0x1c   : > { %p738_p5 = scmp.lt.s32.totalorder %s736_s24, %s731_s19 }
  0x1d   : > { %p734_p12 = pnand %p733_p11, %p732_p2 }
  0x1e   : > { %p739_p7 = por %p738_p5, %p737_p0 }
  0x1f   : > { %p735_p13 = pneg %p734_p12 }
  0x21   : > { %p740_p9 = pnand %p739_p7, %p735_p13 }
  0x23   : > { %743 = shalt.err (!%p740_p9)
}
  0x24   : > { %648 = dma.hbm_to_vmem [thread:$0]  (!%p924_p10), %s134_s6, 64, %s136_s8, %s123_s17  }
  0x25   : > { %144 = sbr.rel (%p891_p8) target bundleno = 245 (0xf5), region = 28  ;;  %s941_s28 = sand.u32 (!%p891_p8), 1, %s821_s10  }
  0x26   : > { %s559_s30 = sshll.u32 (!%p891_p8), %s941_s28, 2  ;;  %s147_s3 = scalar_lea.sflag (!%p891_p8), [#allocation3], %s941_s28 }
  0x27   : > { %s150_s4 = scalar_lea.vmem (!%p891_p8), [#allocation2], %s559_s30 }
  0x2a   : > { %804 = dma.done.wait (%p878_p4), %s147_s3, 64  }
  0x2b   : > { %806 = vsyncadd (%p878_p4), %s147_s3, 4294967232 }
  0x2c   : > { %808 = dma.done.wait (%p40_p1), [#allocation6], 16  }
  0x2d   : > { %810 = vsyncadd (%p40_p1), [#allocation6], 4294967280  ;;  %v180_v0 = vlaneseq  ;;  %v179_v2 = vld [vmem:[%s150_s4] sm:$0xf]  ;;  %v832_v15 = vmov 1.0   ;;  %s561_s15 = sshll.u32 %s941_s28, 1 }
  0x2e   : > { %v197_v4 = vperm.slane %v179_v2, 0  ;;  %v198_v5 = vperm.slane %v179_v2, 2  ;;  %v233_v6 = vperm.slane %v179_v2, 1  ;;  %v234_v7 = vperm.slane %v179_v2, 3  ;;  %v365_v27 = vld [vmem:[#allocation5] sm:$0x1] }
  0x2f   : > { %v954_v1 = vshrl.u32 %v180_v0, 7  ;;  %s629_s20 = sshll.u32 %s869_s13, 1  ;;  %s176_s13 = scalar_lea.vmem [#allocation7], %s561_s15 }
  0x30   : > { %v959_v10 = vperm.slane %v197_v4, 0  ;;  %v961_v11 = vperm.slane %v198_v5, 0  ;;  %v963_v12 = vperm.slane %v233_v6, 1  ;;  %v965_v13 = vperm.slane %v234_v7, 1  ;;  %s466_s7 = scalar_lea.hbm %s1122_s2, %s629_s20  ;;  %s468_s8 = sshll.u32 %s176_s13, 4  ;;  %s469_s8 = int_to_ptr.vmem [resolvable:$true] %s468_s8 }
  0x31   : > { %v196_v3 = vadd.s32 120, %v954_v1  ;;  %v195_v8 = vadd.s32 112, %v954_v1  ;;  %v194_v9 = vadd.s32 104, %v954_v1  ;;  %v193_v14 = vadd.s32 96, %v954_v1  ;;  %s470_s14 = sshll.u32 %s466_s7, 4  ;;  %s456_s17 = scalar_lea.sflag [#allocation4], %s941_s28  ;;  %s471_s14 = int_to_ptr.hbm [resolvable:$true] %s470_s14 }
  0x32   : > { %v192_v16 = vadd.s32 88, %v954_v1  ;;  %v191_v17 = vadd.s32 80, %v954_v1  ;;  %v190_v18 = vadd.s32 72, %v954_v1  ;;  %v189_v19 = vadd.s32 64, %v954_v1  ;;  %s773_s18 = sshra.s32 %s471_s14, 4  ;;  %s779_s24 = scalar_lea.hbm %s1122_s2, 4  ;;  %s774_s18 = int_to_ptr.hbm [resolvable:$true] %s773_s18 }
  0x33   : > { %vm231_vm0 = vcmp.eq.s32.totalorder %v196_v3, %v959_v10  ;;  %vm267_vm1 = vcmp.eq.s32.totalorder %v196_v3, %v963_v12  ;;  %vm232_vm2 = vcmp.eq.s32.totalorder %v196_v3, %v961_v11  ;;  %vm268_vm3 = vcmp.eq.s32.totalorder %v196_v3, %v965_v13  ;;  %s775_s19 = scalar_lea.hbm %s774_s18, 2  ;;  %p780_p9 = scmp.lt.s32.totalorder %s774_s18, %s1122_s2 }
  0x34   : > { %vm299_vm4 = vmor %vm231_vm0, %vm267_vm1  ;;  %vm229_vm5 = vcmp.eq.s32.totalorder %v195_v8, %v959_v10  ;;  %vm265_vm6 = vcmp.eq.s32.totalorder %v195_v8, %v963_v12  ;;  %vm230_vm7 = vcmp.eq.s32.totalorder %v195_v8, %v961_v11  ;;  %vm266_vm8 = vcmp.eq.s32.totalorder %v195_v8, %v965_v13  ;;  %p776_p1 = scmp.ne.s32.totalorder %s774_s18, %s775_s19  ;;  %p781_p10 = scmp.lt.s32.totalorder %s779_s24, %s775_s19 }
  0x35   : > { %594 = vmatpush.msk.msra.mxu0 %vm299_vm4, %v832_v15  ;;  %vm300_vm9 = vmor %vm232_vm2, %vm268_vm3  ;;  %vm227_vm10 = vcmp.eq.s32.totalorder %v194_v9, %v959_v10  ;;  %vm263_vm11 = vcmp.eq.s32.totalorder %v194_v9, %v963_v12  ;;  %vm228_vm13 = vcmp.eq.s32.totalorder %v194_v9, %v961_v11  ;;  %vm264_vm14 = vcmp.eq.s32.totalorder %v194_v9, %v965_v13 }
  0x36   : > { %610 = vmatpush.msk.msra.mxu1 %vm300_vm9, %v832_v15  ;;  %vm297_vm12 = vmor %vm229_vm5, %vm265_vm6  ;;  %vm225_vm0 = vcmp.eq.s32.totalorder %v193_v14, %v959_v10  ;;  %vm261_vm1 = vcmp.eq.s32.totalorder %v193_v14, %v963_v12  ;;  %vm226_vm3 = vcmp.eq.s32.totalorder %v193_v14, %v961_v11  ;;  %vm262_vm4 = vcmp.eq.s32.totalorder %v193_v14, %v965_v13  ;;  %p777_p4 = pnand %p776_p1, %p914_p3  ;;  %p782_p2 = por %p781_p10, %p780_p9 }
  0x37   : > { %595 = vmatpush.msk.msra.mxu0 %vm297_vm12, %v832_v15  ;;  %vm298_vm15 = vmor %vm230_vm7, %vm266_vm8  ;;  %vm223_vm6 = vcmp.eq.s32.totalorder %v192_v16, %v959_v10  ;;  %vm259_vm7 = vcmp.eq.s32.totalorder %v192_v16, %v963_v12  ;;  %vm224_vm9 = vcmp.eq.s32.totalorder %v192_v16, %v961_v11  ;;  %vm221_vm12 = vcmp.eq.s32.totalorder %v191_v17, %v959_v10 }
  0x38   : > { %611 = vmatpush.msk.msra.mxu1 %vm298_vm15, %v832_v15  ;;  %vm295_vm2 = vmor %vm227_vm10, %vm263_vm11  ;;  %vm260_vm10 = vcmp.eq.s32.totalorder %v192_v16, %v965_v13  ;;  %vm222_vm15 = vcmp.eq.s32.totalorder %v191_v17, %v961_v11  ;;  %v188_v20 = vadd.s32 56, %v954_v1  ;;  %v187_v21 = vadd.s32 48, %v954_v1  ;;  %p778_p8 = pneg %p777_p4 }
  0x39   : > { %596 = vmatpush.msk.msra.mxu0 %vm295_vm2, %v832_v15  ;;  %vm296_vm5 = vmor %vm228_vm13, %vm264_vm14  ;;  %vm257_vm13 = vcmp.eq.s32.totalorder %v191_v17, %v963_v12  ;;  %vm219_vm2 = vcmp.eq.s32.totalorder %v190_v18, %v959_v10  ;;  %v186_v22 = vadd.s32 40, %v954_v1  ;;  %v185_v23 = vadd.s32 32, %v954_v1 }
  0x3a   : > { %612 = vmatpush.msk.msra.mxu1 %vm296_vm5, %v832_v15  ;;  %vm293_vm8 = vmor %vm225_vm0, %vm261_vm1  ;;  %vm258_vm0 = vcmp.eq.s32.totalorder %v191_v17, %v965_v13  ;;  %vm220_vm5 = vcmp.eq.s32.totalorder %v190_v18, %v961_v11  ;;  %v184_v24 = vadd.s32 24, %v954_v1  ;;  %v183_v25 = vadd.s32 16, %v954_v1  ;;  %p783_p11 = pnand %p782_p2, %p778_p8 }
  0x3b   : > { %597 = vmatpush.msk.msra.mxu0 %vm293_vm8, %v832_v15  ;;  %vm294_vm11 = vmor %vm226_vm3, %vm262_vm4  ;;  %vm255_vm3 = vcmp.eq.s32.totalorder %v190_v18, %v963_v12  ;;  %vm217_vm8 = vcmp.eq.s32.totalorder %v189_v19, %v959_v10  ;;  %v182_v26 = vadd.s32 8, %v954_v1 }
  0x3c   : > { %613 = vmatpush.msk.msra.mxu1 %vm294_vm11, %v832_v15  ;;  %vm291_vm14 = vmor %vm223_vm6, %vm259_vm7  ;;  %vm256_vm6 = vcmp.eq.s32.totalorder %v190_v18, %v965_v13  ;;  %vm218_vm11 = vcmp.eq.s32.totalorder %v189_v19, %v961_v11 }
  0x3d   : > { %598 = vmatpush.msk.msra.mxu0 %vm291_vm14, %v832_v15  ;;  %vm292_vm1 = vmor %vm224_vm9, %vm260_vm10  ;;  %vm253_vm9 = vcmp.eq.s32.totalorder %v189_v19, %v963_v12  ;;  %vm215_vm14 = vcmp.eq.s32.totalorder %v188_v20, %v959_v10 }
  0x3e   : > { %614 = vmatpush.msk.msra.mxu1 %vm292_vm1, %v832_v15  ;;  %vm289_vm4 = vmor %vm221_vm12, %vm257_vm13  ;;  %vm254_vm12 = vcmp.eq.s32.totalorder %v189_v19, %v965_v13  ;;  %vm216_vm1 = vcmp.eq.s32.totalorder %v188_v20, %v961_v11 }
  0x3f   : > { %599 = vmatpush.msk.msra.mxu0 %vm289_vm4, %v832_v15  ;;  %vm290_vm7 = vmor %vm222_vm15, %vm258_vm0  ;;  %vm251_vm15 = vcmp.eq.s32.totalorder %v188_v20, %v963_v12  ;;  %vm213_vm4 = vcmp.eq.s32.totalorder %v187_v21, %v959_v10 }
  0x40   : > { %615 = vmatpush.msk.msra.mxu1 %vm290_vm7, %v832_v15  ;;  %vm287_vm10 = vmor %vm219_vm2, %vm255_vm3  ;;  %vm252_vm2 = vcmp.eq.s32.totalorder %v188_v20, %v965_v13  ;;  %vm214_vm7 = vcmp.eq.s32.totalorder %v187_v21, %v961_v11 }
  0x41   : > { %600 = vmatpush.msk.msra.mxu0 %vm287_vm10, %v832_v15  ;;  %vm288_vm13 = vmor %vm220_vm5, %vm256_vm6  ;;  %vm249_vm5 = vcmp.eq.s32.totalorder %v187_v21, %v963_v12  ;;  %vm211_vm10 = vcmp.eq.s32.totalorder %v186_v22, %v959_v10 }
  0x42   : > { %616 = vmatpush.msk.msra.mxu1 %vm288_vm13, %v832_v15  ;;  %vm285_vm0 = vmor %vm217_vm8, %vm253_vm9  ;;  %vm250_vm8 = vcmp.eq.s32.totalorder %v187_v21, %v965_v13  ;;  %vm212_vm13 = vcmp.eq.s32.totalorder %v186_v22, %v961_v11 }
  0x43   : > { %601 = vmatpush.msk.msra.mxu0 %vm285_vm0, %v832_v15  ;;  %vm286_vm3 = vmor %vm218_vm11, %vm254_vm12  ;;  %vm247_vm11 = vcmp.eq.s32.totalorder %v186_v22, %v963_v12  ;;  %vm209_vm0 = vcmp.eq.s32.totalorder %v185_v23, %v959_v10 }
  0x44   : > { %617 = vmatpush.msk.msra.mxu1 %vm286_vm3, %v832_v15  ;;  %vm283_vm6 = vmor %vm215_vm14, %vm251_vm15  ;;  %vm248_vm14 = vcmp.eq.s32.totalorder %v186_v22, %v965_v13  ;;  %vm210_vm3 = vcmp.eq.s32.totalorder %v185_v23, %v961_v11 }
  0x45   : > { %602 = vmatpush.msk.msra.mxu0 %vm283_vm6, %v832_v15  ;;  %vm284_vm9 = vmor %vm216_vm1, %vm252_vm2  ;;  %vm245_vm1 = vcmp.eq.s32.totalorder %v185_v23, %v963_v12  ;;  %vm207_vm6 = vcmp.eq.s32.totalorder %v184_v24, %v959_v10 }
  0x46   : > { %618 = vmatpush.msk.msra.mxu1 %vm284_vm9, %v832_v15  ;;  %vm281_vm12 = vmor %vm213_vm4, %vm249_vm5  ;;  %vm246_vm4 = vcmp.eq.s32.totalorder %v185_v23, %v965_v13  ;;  %vm208_vm9 = vcmp.eq.s32.totalorder %v184_v24, %v961_v11 }
  0x47   : > { %603 = vmatpush.msk.msra.mxu0 %vm281_vm12, %v832_v15  ;;  %vm282_vm15 = vmor %vm214_vm7, %vm250_vm8  ;;  %vm243_vm7 = vcmp.eq.s32.totalorder %v184_v24, %v963_v12  ;;  %vm205_vm12 = vcmp.eq.s32.totalorder %v183_v25, %v959_v10 }
  0x48   : > { %619 = vmatpush.msk.msra.mxu1 %vm282_vm15, %v832_v15  ;;  %vm279_vm2 = vmor %vm211_vm10, %vm247_vm11  ;;  %vm244_vm10 = vcmp.eq.s32.totalorder %v184_v24, %v965_v13  ;;  %vm206_vm15 = vcmp.eq.s32.totalorder %v183_v25, %v961_v11 }
  0x49   : > { %604 = vmatpush.msk.msra.mxu0 %vm279_vm2, %v832_v15  ;;  %vm280_vm5 = vmor %vm212_vm13, %vm248_vm14  ;;  %vm241_vm13 = vcmp.eq.s32.totalorder %v183_v25, %v963_v12  ;;  %vm242_vm2 = vcmp.eq.s32.totalorder %v183_v25, %v965_v13 }
  0x4a   : > { %620 = vmatpush.msk.msra.mxu1 %vm280_vm5, %v832_v15  ;;  %vm277_vm8 = vmor %vm209_vm0, %vm245_vm1  ;;  %vm203_vm1 = vcmp.eq.s32.totalorder %v182_v26, %v959_v10  ;;  %vm239_vm5 = vcmp.eq.s32.totalorder %v182_v26, %v963_v12 }
  0x4b   : > { %605 = vmatpush.msk.msra.mxu0 %vm277_vm8, %v832_v15  ;;  %vm278_vm11 = vmor %vm210_vm3, %vm246_vm4  ;;  %vm204_vm4 = vcmp.eq.s32.totalorder %v182_v26, %v961_v11  ;;  %vm240_vm8 = vcmp.eq.s32.totalorder %v182_v26, %v965_v13 }
  0x4c   : > { %621 = vmatpush.msk.msra.mxu1 %vm278_vm11, %v832_v15  ;;  %vm275_vm14 = vmor %vm207_vm6, %vm243_vm7  ;;  %vm201_vm7 = vcmp.eq.s32.totalorder %v954_v1, %v959_v10  ;;  %vm202_vm11 = vcmp.eq.s32.totalorder %v954_v1, %v961_v11 }
  0x4d   : > { %606 = vmatpush.msk.msra.mxu0 %vm275_vm14, %v832_v15  ;;  %vm276_vm0 = vmor %vm208_vm9, %vm244_vm10  ;;  %vm237_vm9 = vcmp.eq.s32.totalorder %v954_v1, %v963_v12 }
  0x4e   : > { %622 = vmatpush.msk.msra.mxu1 %vm276_vm0, %v832_v15  ;;  %vm273_vm3 = vmor %vm205_vm12, %vm241_vm13  ;;  %vm238_vm12 = vcmp.eq.s32.totalorder %v954_v1, %v965_v13 }
  0x4f   : > { %607 = vmatpush.msk.msra.mxu0 %vm273_vm3, %v832_v15  ;;  %vm274_vm6 = vmor %vm206_vm15, %vm242_vm2 }
  0x50   : > { %623 = vmatpush.msk.msra.mxu1 %vm274_vm6, %v832_v15  ;;  %vm271_vm10 = vmor %vm203_vm1, %vm239_vm5  ;;  %vm447_vm6 = vcmask 1040384  }
  0x51   : > { %608 = vmatpush.msk.msra.mxu0 %vm271_vm10, %v832_v15  ;;  %vm272_vm13 = vmor %vm204_vm4, %vm240_vm8 }
  0x52   : > { %624 = vmatpush.msk.msra.mxu1 %vm272_vm13, %v832_v15  ;;  %vm269_vm14 = vmor %vm201_vm7, %vm237_vm9  ;;  %vm452_vm9 = vcmp.lt.s32.totalorder %v180_v0, 256 }
  0x53   : > { %609 = vmatpush.msk.msra.mxu0 %vm269_vm14, %v832_v15  ;;  %vm270_vm15 = vmor %vm202_vm11, %vm238_vm12 }
  0x54   : > { %625 = vmatpush.msk.msra.mxu1 %vm270_vm15, %v832_v15  ;;  %382 = vmatmul.f32.vlgmr.msra.gmra.mxu0 %v365_v27 }
  0x55   : > { %402 = vmatmul.f32.vlgmr.msra.gmra.mxu1 %v365_v27 }
  0xd1   : > { %v383_v28 = vpop.f32.mrf.mxu0 }
  0xd2   : > { %v626_v29 = vmul.f32 -1.442695, %v383_v28  ;;  %v403_v30 = vpop.f32.mrf.mxu1 }
  0xd3   : > { %v627_v31 = vmul.f32 -1.442695, %v403_v30 }
  0xd4   : > { %691 = vpow2.f32 %v626_v29 }
  0xd5   : > { %693 = vpow2.f32 %v627_v31 }
  0xda   : > { %v692_v32 = vpop.eup %691 }
  0xdb   : > { %v694_v33 = vpop.eup %693  ;;  %v412_v34 = vadd.f32 1.0, %v692_v32 }
  0xdc   : > { %v413_v35 = vadd.f32 1.0, %v694_v33 }
  0xdd   : > { %695 = vrcp.f32 %v412_v34  ;;  %vm419_vm1 = vweird.f32 %v412_v34  ;;  %v425_v46 = vand.u32 2147483648, %v412_v34  ;;  %v423_v49 = vand.u32 2147483647, %v412_v34 }
  0xde   : > { %697 = vrcp.f32 %v413_v35  ;;  %v440_v43 = vand.u32 2147483648, %v413_v35  ;;  %v438_v45 = vand.u32 2147483647, %v413_v35  ;;  %vm434_vm3 = vweird.f32 %v413_v35 }
  0xdf   : > { %v426_v54 = vor.u32 1.1754944e-38, %v425_v46  ;;  %vm424_vm7 = vcmp.eq.f32.partialorder %v423_v49, 8.507059e+37 }
  0xe0   : > { %v441_v51 = vor.u32 1.1754944e-38, %v440_v43  ;;  %vm439_vm8 = vcmp.eq.f32.partialorder %v438_v45, 8.507059e+37 }
  0xe3   : > { %v696_v36 = vpop.eup %695 }
  0xe4   : > { %v698_v37 = vpop.eup %697  ;;  %v415_v38 = vmul.f32 %v696_v36, %v412_v34  ;;  %vm420_vm2 = vweird.f32 %v696_v36 }
  0xe5   : > { %v430_v39 = vmul.f32 %v698_v37, %v413_v35  ;;  %vm435_vm0 = vweird.f32 %v698_v37  ;;  %vm1084_vm5 = vmor %vm419_vm1, %vm420_vm2 }
  0xe6   : > { %v416_v40 = vsub.f32 1.0, %v415_v38  ;;  %vm436_vm4 = vmor %vm434_vm3, %vm435_vm0 }
  0xe7   : > { %v431_v41 = vsub.f32 1.0, %v430_v39 }
  0xe8   : > { %v417_v42 = vmul.f32 %v696_v36, %v416_v40 }
  0xe9   : > { %v432_v44 = vmul.f32 %v698_v37, %v431_v41 }
  0xea   : > { %v418_v47 = vadd.f32 %v696_v36, %v417_v42 }
  0xeb   : > { %v433_v50 = vadd.f32 %v698_v37, %v432_v44 }
  0xec   : > { %v422_v52 = vsel %vm1084_vm5, %v696_v36, %v418_v47 }
  0xed   : > { %v437_v53 = vsel %vm436_vm4, %v698_v37, %v433_v50  ;;  %v427_v57 = vsel %vm424_vm7, %v426_v54, %v422_v52 }
  0xee   : > { %v442_v55 = vsel %vm439_vm8, %v441_v51, %v437_v53 }
  0xef   : > { %v446_v56 = vrot.slane %v442_v55, 7 }
  0xf1   : > { %v448_v58 = vsel %vm447_vm6, %v427_v57, %v446_v56 }
  0xf2   : > { %454 = vst.msk [vmem:[%s176_s13] sm:$0x3] %vm452_vm9, %v448_v58 }
  0xf3   : > { %786 = shalt.err (!%p783_p11)
}
  0xf4   : > { %639 = dma.vmem_to_hbm [thread:$0]  (%p914_p3), %s469_s8, 32, %s471_s14, %s456_s17  }
  0xf5 PF: > { %s482_s28 = sand.u32 1, %s817_s9   ;;  %p1130_p12 = scmp.ge.s32.totalorder %s829_s12, 2 }
  0xf6   : > { %s483_s30 = scalar_lea.sflag [#allocation4], %s482_s28 }
  0xf7   : > { %p650_p13 = pnand %p1130_p12, %p883_p6 }
  0xf9   : > { %p651_p0 = pneg %p650_p13 }
  0xfb   : > { %812 = dma.done.wait (%p651_p0), %s483_s30, 32  }
  0xfc   : > { %814 = vsyncadd (%p651_p0), %s483_s30, 4294967264  ;;  %p16_p5 = scmp.ge.s32.totalorder %s901_s23, 4   ;;  %s1131_s9 = smov %s821_s10 }
  0xfd   : > { %s1132_s10 = smov %s825_s11  ;;  %s1133_s11 = smov %s910_s26 }
  0xfe   : > { %s1134_s12 = smov %s901_s23  ;;  %18 = sbr.rel (!%p16_p5) target bundleno = 6 (0x6), region = 77 }
 0x103   :  { %489 = vsyncpa [#allocation3], 1 }
 0x104   :  { %491 = vsyncpa [#allocation3 + $0x1], 1 }
 0x105   :  { %492 = vsyncpa [#allocation6], 1 }
 0x106   :  { %493 = vsyncpa [#allocation4], 1 }
 0x107   :  { %495 = vsyncpa [#allocation4 + $0x1], 1 }

</bundles_post_ra>
